<compile_context>
chip_gen: v6e
topology: v6e:2x2x1
jax: 0.10.0
libtpu: 0.0.40
codegen_flags: <defaults>
</compile_context>

<pallas_src>
import jax
import jax.numpy as jnp
from jax.experimental import pallas as pl
from jax.experimental.pallas import tpu as pltpu


def _make_extreme_kernel(n_top: int, n_bottom: int, n_tiles: int):
    """Build the Pallas kernel for fixed (n_top, n_bottom, n_tiles).

    The kernel sees lane-dense blocks:
      x_ref    : (N_TILES, Ct)  float
      mask_ref : (N_TILES, Ct)  int32 (nonzero == padded)
      val_ref  : (K, Ct)        float
      idx_ref  : (K, Ct)        int32
    """

    def kernel(x_ref, mask_ref, val_ref, idx_ref):
        x = x_ref[...]                                   # (N, Ct)
        cdt = x.dtype
        m = mask_ref[...] != 0                           # (N, Ct) bool

        neg_inf = jnp.array(-jnp.inf, dtype=cdt)
        zero = jnp.array(0.0, dtype=cdt)
        sentinel = jnp.int32(n_tiles)

        # (N, 1) iota over the tiles axis; broadcasts over lanes.
        iota = jax.lax.broadcasted_iota(jnp.int32, (n_tiles, 1), 0)

        def select(base, k, negate):
            """Iterative top-k (largest first) over axis 0.

            Masked positions are pre-filled with -inf; a boolean `removed`
            mask tracks already-selected rows so repeated -inf ties still
            yield k distinct indices. Returns k (1, Ct) value/index rows.
            """
            vals, idxs = [], []
            masked = jnp.where(m, neg_inf, base)                      # (N, Ct)
            removed = jnp.zeros(masked.shape, dtype=jnp.bool_)
            for _ in range(k):
                active = jnp.where(removed, neg_inf, masked)
                v = jnp.max(active, axis=0, keepdims=True)            # (1, Ct)
                hit = (active == v) & jnp.logical_not(removed)        # (N, Ct)
                hit_idx = jnp.where(hit, iota, sentinel)              # (N, Ct)
                i = jnp.min(hit_idx, axis=0, keepdims=True)           # (1, Ct) first hit
                removed = removed | (hit_idx == i)
                # masked (-inf) selections become 0, as in torch
                v_out = jnp.where(v == neg_inf, zero, -v if negate else v)
                vals.append(v_out)
                idxs.append(i)
            return vals, idxs

        val_rows, idx_rows = [], []
        if n_top:
            tv, ti = select(x, n_top, negate=False)        # largest first
            val_rows += tv
            idx_rows += ti
        if n_bottom:
            bv, bi = select(-x, n_bottom, negate=True)     # smallest first
            val_rows += bv
            idx_rows += bi

        val_ref[...] = jnp.concatenate(val_rows, axis=0).astype(val_ref.dtype)
        idx_ref[...] = jnp.concatenate(idx_rows, axis=0)

    return kernel


def _choose_lane_tile(n_tiles: int, c_total: int, itemsize: int):
    """Pick the lane tile Ct and the padded lane extent C_pad.

    Whole C in a single block if it fits the VMEM budget; otherwise tile the
    lane axis with a multiple of 128 (keeps every block within the default
    scoped VMEM and v7x's 64 MiB physical VMEM).
    """
    budget = 24 * 1024 * 1024
    # ~6x the x-block bytes live at once: x, int32 mask, masked copy,
    # removed/active temporaries, plus double-buffered input DMA.
    per_lane_bytes = max(1, n_tiles * max(itemsize, 4) * 6)
    max_lanes = max(128, (budget // per_lane_bytes) // 128 * 128)
    if c_total <= max_lanes:
        return c_total, c_total          # one block spanning the full lane dim
    ct = min(max_lanes, 2048)
    c_pad = ((c_total + ct - 1) // ct) * ct
    return ct, c_pad


def extreme_layer(x, mask=None, *, n_top=None, n_bottom=None, return_indices=False):
    """JAX/Pallas equivalent of ExtremeLayer.forward (dim=1)."""
    if not (n_top is not None or n_bottom is not None):
        raise ValueError("one of n_top or n_bottom must have a value.")
    if not ((n_top is not None and n_top > 0) or (n_bottom is not None and n_bottom > 0)):
        raise ValueError("one of n_top or n_bottom must have a value > 0.")
    n_top = n_top or 0
    n_bottom = n_bottom or 0

    if not jnp.issubdtype(x.dtype, jnp.floating):
        x = x.astype(jnp.float32)

    B, N, F = x.shape
    K = n_top + n_bottom
    C = B * F

    # Lane-dense layout plumbing (not compute): (B, N, F) -> (N, B*F).
    x_t = jnp.transpose(x, (1, 0, 2)).reshape(N, C)
    if mask is None:
        mask_t = jnp.zeros((N, C), jnp.int32)
    else:
        mask_t = jnp.transpose(
            jnp.broadcast_to(mask, (B, N, F)).astype(jnp.int32), (1, 0, 2)
        ).reshape(N, C)

    Ct, C_pad = _choose_lane_tile(N, C, x.dtype.itemsize)
    if C_pad != C:
        x_t = jnp.pad(x_t, ((0, 0), (0, C_pad - C)))
        mask_t = jnp.pad(mask_t, ((0, 0), (0, C_pad - C)), constant_values=1)

    kernel = _make_extreme_kernel(n_top, n_bottom, N)

    vals_t, idx_t = pl.pallas_call(
        kernel,
        out_shape=(
            jax.ShapeDtypeStruct((K, C_pad), x.dtype),
            jax.ShapeDtypeStruct((K, C_pad), jnp.int32),
        ),
        grid=(C_pad // Ct,),
        in_specs=[
            pl.BlockSpec((N, Ct), lambda c: (0, c)),
            pl.BlockSpec((N, Ct), lambda c: (0, c)),
        ],
        out_specs=(
            pl.BlockSpec((K, Ct), lambda c: (0, c)),
            pl.BlockSpec((K, Ct), lambda c: (0, c)),
        ),
        compiler_params=pltpu.CompilerParams(dimension_semantics=("parallel",)),
    )(x_t, mask_t)

    # Back to (B, K, F).
    vals = jnp.transpose(vals_t[:, :C].reshape(K, B, F), (1, 0, 2))
    idxs = jnp.transpose(idx_t[:, :C].reshape(K, B, F), (1, 0, 2))

    if return_indices:
        return vals, idxs
    return vals


def _reference_extreme(x, mask, n_top, n_bottom):
    """Pure-JAX reference (mirrors torch semantics) for a sanity check."""
    x = x.astype(jnp.float32)
    m = mask.astype(bool)
    pieces = []
    if n_top:
        top = -jnp.sort(-jnp.where(m, -jnp.inf, x), axis=1)[:, :n_top, :]
        top = jnp.where(jnp.isneginf(top), 0.0, top)
        pieces.append(top)
    if n_bottom:
        bot = jnp.sort(jnp.where(m, jnp.inf, x), axis=1)[:, :n_bottom, :]
        bot = jnp.where(jnp.isposinf(bot), 0.0, bot)
        pieces.append(bot)
    return jnp.concatenate(pieces, axis=1)


if __name__ == "__main__":
    # Small CHOWDER-like shapes: batch=2, n_tiles=16, in_features=8.
    B, N, F = 2, 16, 8
    N_TOP, N_BOTTOM = 2, 2

    key = jax.random.PRNGKey(0)
    kx, _ = jax.random.split(key)
    x = jax.random.normal(kx, (B, N, F), dtype=jnp.float32)

    # Mark the last 5 tiles of batch element 1 as padding.
    tile_ids = jnp.arange(N)[None, :, None]                      # (1, N, 1)
    batch_ids = jnp.arange(B)[:, None, None]                     # (B, 1, 1)
    mask = (batch_ids == 1) & (tile_ids >= N - 5)                # (B, N, 1) bool

    values, indices = extreme_layer(
        x, mask, n_top=N_TOP, n_bottom=N_BOTTOM, return_indices=True
    )
    values = jax.block_until_ready(values)
    indices = jax.block_until_ready(indices)

    assert values.shape == (B, N_TOP + N_BOTTOM, F)
    assert indices.shape == (B, N_TOP + N_BOTTOM, F)

    ref_v = _reference_extreme(x, mask, N_TOP, N_BOTTOM)
    assert jnp.allclose(values.astype(jnp.float32), ref_v, atol=1e-6), "value mismatch"

    # Index check (random normal -> no ties, so this is deterministic).
    ref_top_idx = jnp.argsort(jnp.where(mask, jnp.inf, -x), axis=1)[:, :N_TOP, :]
    ref_bot_idx = jnp.argsort(jnp.where(mask, jnp.inf, x), axis=1)[:, :N_BOTTOM, :]
    ref_idx = jnp.concatenate([ref_top_idx, ref_bot_idx], axis=1).astype(jnp.int32)
    assert jnp.array_equal(indices, ref_idx), "index mismatch"

    # mask=None path.
    v_nm = jax.block_until_ready(extreme_layer(x, None, n_top=N_TOP, n_bottom=N_BOTTOM))
    ref_nm = _reference_extreme(x, jnp.zeros((B, N, 1), bool), N_TOP, N_BOTTOM)
    assert jnp.allclose(v_nm.astype(jnp.float32), ref_nm, atol=1e-6), "value mismatch (no mask)"

    # top-only path.
    v_top = jax.block_until_ready(extreme_layer(x, mask, n_top=3, n_bottom=0))
    ref_top = _reference_extreme(x, mask, 3, 0)
    assert v_top.shape == (B, 3, F)
    assert jnp.allclose(v_top.astype(jnp.float32), ref_top, atol=1e-6), "value mismatch (top only)"

    print("KERNEL_OK")
</pallas_src>

<mosaic_0001>
module attributes {stable_mosaic.version = 11 : i64} {
  func.func @kernel(%arg0: i32, %arg1: memref<16x16xf32, #tpu.memory_space<vmem>>, %arg2: memref<16x16xi32, #tpu.memory_space<vmem>>, %arg3: memref<4x16xf32, #tpu.memory_space<vmem>>, %arg4: memref<4x16xi32, #tpu.memory_space<vmem>>) attributes {dimension_semantics = [#tpu.dimension_semantics<parallel>], iteration_bounds = array<i64: 1>, scalar_prefetch = 0 : i64, scratch_operands = 0 : i64, tpu.core_type = #tpu.core_type<tc>, window_params = [{transform_indices = @transform_0, window_bounds = array<i64: 16, 16>}, {transform_indices = @transform_1, window_bounds = array<i64: 16, 16>}, {transform_indices = @transform_2, window_bounds = array<i64: 4, 16>}, {transform_indices = @transform_3, window_bounds = array<i64: 4, 16>}]} {
    %c0 = arith.constant 0 : index
    %c0_0 = arith.constant 0 : index
    %0 = vector.load %arg1[%c0, %c0_0] : memref<16x16xf32, #tpu.memory_space<vmem>>, vector<16x16xf32>
    %c0_1 = arith.constant 0 : index
    %c0_2 = arith.constant 0 : index
    %1 = vector.load %arg2[%c0_1, %c0_2] : memref<16x16xi32, #tpu.memory_space<vmem>>, vector<16x16xi32>
    %c0_i32 = arith.constant 0 : i32
    %2 = vector.broadcast %c0_i32 : i32 to vector<16x16xi32>
    %3 = arith.cmpi ne, %1, %2 : vector<16x16xi32>
    %4 = tpu.iota {dimensions = array<i32: 0>} : vector<16x1xi32>
    %cst = arith.constant 0xFF800000 : f32
    %5 = vector.broadcast %cst : f32 to vector<16x16xf32>
    %6 = arith.select %3, %5, %0 : vector<16x16xi1>, vector<16x16xf32>
    %false = arith.constant false
    %7 = vector.broadcast %false : i1 to vector<16x16xi1>
    %cst_3 = arith.constant 0xFF800000 : f32
    %8 = vector.broadcast %cst_3 : f32 to vector<16x16xf32>
    %9 = arith.select %7, %8, %6 : vector<16x16xi1>, vector<16x16xf32>
    %cst_4 = arith.constant dense<0xFF800000> : vector<16xf32>
    %10 = vector.multi_reduction <maximumf>, %9, %cst_4 [0] : vector<16x16xf32> to vector<16xf32>
    %11 = vector.shape_cast %10 : vector<16xf32> to vector<1x16xf32>
    %12 = vector.broadcast %11 : vector<1x16xf32> to vector<16x16xf32>
    %13 = arith.cmpf oeq, %9, %12 : vector<16x16xf32>
    %cst_5 = arith.constant dense<true> : vector<16x16xi1>
    %14 = arith.xori %7, %cst_5 : vector<16x16xi1>
    %15 = arith.andi %13, %14 : vector<16x16xi1>
    %c16_i32 = arith.constant 16 : i32
    %16 = vector.shape_cast %4 : vector<16x1xi32> to vector<16x1xi32>
    %17 = vector.broadcast %16 : vector<16x1xi32> to vector<16x16xi32>
    %18 = vector.broadcast %c16_i32 : i32 to vector<16x16xi32>
    %19 = arith.select %15, %17, %18 : vector<16x16xi1>, vector<16x16xi32>
    %cst_6 = arith.constant dense<2147483647> : vector<16xi32>
    %20 = vector.multi_reduction <minsi>, %19, %cst_6 [0] : vector<16x16xi32> to vector<16xi32>
    %21 = vector.shape_cast %20 : vector<16xi32> to vector<1x16xi32>
    %22 = vector.broadcast %21 : vector<1x16xi32> to vector<16x16xi32>
    %23 = arith.cmpi eq, %19, %22 : vector<16x16xi32>
    %24 = arith.ori %7, %23 : vector<16x16xi1>
    %cst_7 = arith.constant 0xFF800000 : f32
    %25 = vector.broadcast %cst_7 : f32 to vector<1x16xf32>
    %26 = arith.cmpf oeq, %11, %25 : vector<1x16xf32>
    %cst_8 = arith.constant 0.000000e+00 : f32
    %27 = vector.broadcast %cst_8 : f32 to vector<1x16xf32>
    %28 = arith.select %26, %27, %11 : vector<1x16xi1>, vector<1x16xf32>
    %cst_9 = arith.constant 0xFF800000 : f32
    %29 = vector.broadcast %cst_9 : f32 to vector<16x16xf32>
    %30 = arith.select %24, %29, %6 : vector<16x16xi1>, vector<16x16xf32>
    %cst_10 = arith.constant dense<0xFF800000> : vector<16xf32>
    %31 = vector.multi_reduction <maximumf>, %30, %cst_10 [0] : vector<16x16xf32> to vector<16xf32>
    %32 = vector.shape_cast %31 : vector<16xf32> to vector<1x16xf32>
    %33 = vector.broadcast %32 : vector<1x16xf32> to vector<16x16xf32>
    %34 = arith.cmpf oeq, %30, %33 : vector<16x16xf32>
    %cst_11 = arith.constant dense<true> : vector<16x16xi1>
    %35 = arith.xori %24, %cst_11 : vector<16x16xi1>
    %36 = arith.andi %34, %35 : vector<16x16xi1>
    %c16_i32_12 = arith.constant 16 : i32
    %37 = vector.shape_cast %4 : vector<16x1xi32> to vector<16x1xi32>
    %38 = vector.broadcast %37 : vector<16x1xi32> to vector<16x16xi32>
    %39 = vector.broadcast %c16_i32_12 : i32 to vector<16x16xi32>
    %40 = arith.select %36, %38, %39 : vector<16x16xi1>, vector<16x16xi32>
    %cst_13 = arith.constant dense<2147483647> : vector<16xi32>
    %41 = vector.multi_reduction <minsi>, %40, %cst_13 [0] : vector<16x16xi32> to vector<16xi32>
    %42 = vector.shape_cast %41 : vector<16xi32> to vector<1x16xi32>
    %cst_14 = arith.constant 0xFF800000 : f32
    %43 = vector.broadcast %cst_14 : f32 to vector<1x16xf32>
    %44 = arith.cmpf oeq, %32, %43 : vector<1x16xf32>
    %cst_15 = arith.constant 0.000000e+00 : f32
    %45 = vector.broadcast %cst_15 : f32 to vector<1x16xf32>
    %46 = arith.select %44, %45, %32 : vector<1x16xi1>, vector<1x16xf32>
    %cst_16 = arith.constant 0.000000e+00 : f32
    %47 = vector.broadcast %cst_16 : f32 to vector<16x16xf32>
    %48 = arith.subf %47, %0 : vector<16x16xf32>
    %cst_17 = arith.constant 0xFF800000 : f32
    %49 = vector.broadcast %cst_17 : f32 to vector<16x16xf32>
    %50 = arith.select %3, %49, %48 : vector<16x16xi1>, vector<16x16xf32>
    %false_18 = arith.constant false
    %51 = vector.broadcast %false_18 : i1 to vector<16x16xi1>
    %cst_19 = arith.constant 0xFF800000 : f32
    %52 = vector.broadcast %cst_19 : f32 to vector<16x16xf32>
    %53 = arith.select %51, %52, %50 : vector<16x16xi1>, vector<16x16xf32>
    %cst_20 = arith.constant dense<0xFF800000> : vector<16xf32>
    %54 = vector.multi_reduction <maximumf>, %53, %cst_20 [0] : vector<16x16xf32> to vector<16xf32>
    %55 = vector.shape_cast %54 : vector<16xf32> to vector<1x16xf32>
    %56 = vector.broadcast %55 : vector<1x16xf32> to vector<16x16xf32>
    %57 = arith.cmpf oeq, %53, %56 : vector<16x16xf32>
    %cst_21 = arith.constant dense<true> : vector<16x16xi1>
    %58 = arith.xori %51, %cst_21 : vector<16x16xi1>
    %59 = arith.andi %57, %58 : vector<16x16xi1>
    %c16_i32_22 = arith.constant 16 : i32
    %60 = vector.shape_cast %4 : vector<16x1xi32> to vector<16x1xi32>
    %61 = vector.broadcast %60 : vector<16x1xi32> to vector<16x16xi32>
    %62 = vector.broadcast %c16_i32_22 : i32 to vector<16x16xi32>
    %63 = arith.select %59, %61, %62 : vector<16x16xi1>, vector<16x16xi32>
    %cst_23 = arith.constant dense<2147483647> : vector<16xi32>
    %64 = vector.multi_reduction <minsi>, %63, %cst_23 [0] : vector<16x16xi32> to vector<16xi32>
    %65 = vector.shape_cast %64 : vector<16xi32> to vector<1x16xi32>
    %66 = vector.broadcast %65 : vector<1x16xi32> to vector<16x16xi32>
    %67 = arith.cmpi eq, %63, %66 : vector<16x16xi32>
    %68 = arith.ori %51, %67 : vector<16x16xi1>
    %cst_24 = arith.constant 0xFF800000 : f32
    %69 = vector.broadcast %cst_24 : f32 to vector<1x16xf32>
    %70 = arith.cmpf oeq, %55, %69 : vector<1x16xf32>
    %cst_25 = arith.constant 0.000000e+00 : f32
    %71 = vector.broadcast %cst_25 : f32 to vector<1x16xf32>
    %72 = arith.subf %71, %55 : vector<1x16xf32>
    %cst_26 = arith.constant 0.000000e+00 : f32
    %73 = vector.broadcast %cst_26 : f32 to vector<1x16xf32>
    %74 = arith.select %70, %73, %72 : vector<1x16xi1>, vector<1x16xf32>
    %cst_27 = arith.constant 0xFF800000 : f32
    %75 = vector.broadcast %cst_27 : f32 to vector<16x16xf32>
    %76 = arith.select %68, %75, %50 : vector<16x16xi1>, vector<16x16xf32>
    %cst_28 = arith.constant dense<0xFF800000> : vector<16xf32>
    %77 = vector.multi_reduction <maximumf>, %76, %cst_28 [0] : vector<16x16xf32> to vector<16xf32>
    %78 = vector.shape_cast %77 : vector<16xf32> to vector<1x16xf32>
    %79 = vector.broadcast %78 : vector<1x16xf32> to vector<16x16xf32>
    %80 = arith.cmpf oeq, %76, %79 : vector<16x16xf32>
    %cst_29 = arith.constant dense<true> : vector<16x16xi1>
    %81 = arith.xori %68, %cst_29 : vector<16x16xi1>
    %82 = arith.andi %80, %81 : vector<16x16xi1>
    %c16_i32_30 = arith.constant 16 : i32
    %83 = vector.shape_cast %4 : vector<16x1xi32> to vector<16x1xi32>
    %84 = vector.broadcast %83 : vector<16x1xi32> to vector<16x16xi32>
    %85 = vector.broadcast %c16_i32_30 : i32 to vector<16x16xi32>
    %86 = arith.select %82, %84, %85 : vector<16x16xi1>, vector<16x16xi32>
    %cst_31 = arith.constant dense<2147483647> : vector<16xi32>
    %87 = vector.multi_reduction <minsi>, %86, %cst_31 [0] : vector<16x16xi32> to vector<16xi32>
    %88 = vector.shape_cast %87 : vector<16xi32> to vector<1x16xi32>
    %cst_32 = arith.constant 0xFF800000 : f32
    %89 = vector.broadcast %cst_32 : f32 to vector<1x16xf32>
    %90 = arith.cmpf oeq, %78, %89 : vector<1x16xf32>
    %cst_33 = arith.constant 0.000000e+00 : f32
    %91 = vector.broadcast %cst_33 : f32 to vector<1x16xf32>
    %92 = arith.subf %91, %78 : vector<1x16xf32>
    %cst_34 = arith.constant 0.000000e+00 : f32
    %93 = vector.broadcast %cst_34 : f32 to vector<1x16xf32>
    %94 = arith.select %90, %93, %92 : vector<1x16xi1>, vector<1x16xf32>
    %95 = tpu.concatenate %28, %46, %74, %94 in 0 : vector<1x16xf32>, vector<1x16xf32>, vector<1x16xf32>, vector<1x16xf32> -> vector<4x16xf32>
    %c0_35 = arith.constant 0 : index
    %c0_36 = arith.constant 0 : index
    %96 = vector.load %arg3[%c0_35, %c0_36] : memref<4x16xf32, #tpu.memory_space<vmem>>, vector<4x16xf32>
    tpu.vector_store %arg3[%c0_35, %c0_36], %95 {strides = array<i32>} : memref<4x16xf32, #tpu.memory_space<vmem>>, vector<4x16xf32>,
    %97 = tpu.concatenate %21, %42, %65, %88 in 0 : vector<1x16xi32>, vector<1x16xi32>, vector<1x16xi32>, vector<1x16xi32> -> vector<4x16xi32>
    %c0_37 = arith.constant 0 : index
    %c0_38 = arith.constant 0 : index
    %98 = vector.load %arg4[%c0_37, %c0_38] : memref<4x16xi32, #tpu.memory_space<vmem>>, vector<4x16xi32>
    tpu.vector_store %arg4[%c0_37, %c0_38], %97 {strides = array<i32>} : memref<4x16xi32, #tpu.memory_space<vmem>>, vector<4x16xi32>,
    return
  }
  func.func @transform_0(%arg0: i32) -> (i32, i32) {
    %c0_i32 = arith.constant 0 : i32
    %c0_i32_0 = arith.constant 0 : i32
    return %c0_i32, %arg0 : i32, i32
  }
  func.func @transform_1(%arg0: i32) -> (i32, i32) {
    %c0_i32 = arith.constant 0 : i32
    %c0_i32_0 = arith.constant 0 : i32
    return %c0_i32, %arg0 : i32, i32
  }
  func.func @transform_2(%arg0: i32) -> (i32, i32) {
    %c0_i32 = arith.constant 0 : i32
    %c0_i32_0 = arith.constant 0 : i32
    return %c0_i32, %arg0 : i32, i32
  }
  func.func @transform_3(%arg0: i32) -> (i32, i32) {
    %c0_i32 = arith.constant 0 : i32
    %c0_i32_0 = arith.constant 0 : i32
    return %c0_i32, %arg0 : i32, i32
  }
}

</mosaic_0001>

<bundles_post_ra>
// kernel: tpu_custom_call.1
= control target key start
LH: loop header
LB: loop body
LE: loop exit
PB: predicated region body
PF: predicated region fallthrough
CT: control target
= control target key end

     0   :  { %9 = vsyncpa [#allocation3], 0  ;;  %s480_s0 = inlined_call_operand.hbm [shape: f32[16,16], index: 0, kind: input, shape index: {}]   ;;  %s481_s1 = inlined_call_operand.hbm [shape: s32[16,16], index: 1, kind: input, shape index: {}]   ;;  %s482_s2 = inlined_call_operand.hbm [shape: f32[4,16], index: 2, kind: output, shape index: {0}]   ;;  %s483_s3 = inlined_call_operand.hbm [shape: s32[4,16], index: 3, kind: output, shape index: {1}]  }
   0x1   :  { %10 = vsyncpa [#allocation6], 0 }
   0x2   :  { %11 = vsyncpa [#allocation4], 0 }
   0x3   :  { %12 = vsyncpa [#allocation9], 0  ;;  %s326_s12 = smov [#allocation2]  }
   0x4   :  { %s18_s13 = sshll.u32 %s326_s12, 4  ;;  %s19_s13 = int_to_ptr.vmem [resolvable:$true] %s18_s13 }
   0x5   :  { %s246_s14 = scalar_lea.vmem %s19_s13, 256  ;;  %p251_p1 = scmp.lt.s32.totalorder %s19_s13, %s19_s13 }
   0x6   :  { %p247_p0 = scmp.ne.s32.totalorder %s19_s13, %s246_s14  ;;  %p252_p2 = scmp.lt.s32.totalorder %s246_s14, %s246_s14 }
   0x8   :  { %p253_p3 = por %p252_p2, %p251_p1 }
   0xa   :  { %p254_p4 = pnand %p253_p3, %p247_p0 }
   0xc   :  { %257 = shalt.err (!%p254_p4)
}
   0xd   :  { %s327_s15 = smov 128   ;;  %s328_s16 = smov 8  }
   0xe   :  { %24 = dma.hbm_to_vmem [thread:$0]  %s480_s0, 256, %s19_s13, [#allocation3], %s327_s15, %s327_s15, %s328_s16  }
   0xf   :  { %s329_s19 = smov [#allocation5]  }
  0x10   :  { %s30_s20 = sshll.u32 %s329_s19, 4  ;;  %s31_s20 = int_to_ptr.vmem [resolvable:$true] %s30_s20 }
  0x11   :  { %s266_s21 = scalar_lea.vmem %s31_s20, 256  ;;  %p271_p6 = scmp.lt.s32.totalorder %s31_s20, %s31_s20 }
  0x12   :  { %p267_p5 = scmp.ne.s32.totalorder %s31_s20, %s266_s21  ;;  %p272_p7 = scmp.lt.s32.totalorder %s266_s21, %s266_s21 }
  0x14   :  { %p273_p8 = por %p272_p7, %p271_p6 }
  0x16   :  { %p274_p9 = pnand %p273_p8, %p267_p5 }
  0x18   :  { %277 = shalt.err (!%p274_p9)
}
  0x19   :  { %36 = dma.hbm_to_vmem [thread:$0]  %s481_s1, 256, %s31_s20, [#allocation6], %s327_s15, %s327_s15, %s328_s16  }
  0x1a   :  { %318 = dma.done.wait [#allocation3], 256  }
  0x1b   :  { %319 = vsyncadd [#allocation3], 4294967040 }
  0x1c   :  { %320 = dma.done.wait [#allocation6], 256  }
  0x1d   :  { %321 = vsyncadd [#allocation6], 4294967040  ;;  %v43_v0 = vld [vmem:[#allocation2] sm:$0xff]  ;;  %v44_v1 = vld [vmem:[#allocation2 + $0x8] sm:$0xff]  ;;  %vm484_vm0 = vcmask 130048   ;;  %v49_v18 = vlaneseq  ;;  %s331_s0 = smov [#allocation7]  }
  0x1e   :  { %v45_v2 = vld [vmem:[#allocation5] sm:$0xff]  ;;  %v46_v3 = vld [vmem:[#allocation5 + $0x8] sm:$0xff]  ;;  %v119_v4 = vsub.f32 0.0, %v43_v0  ;;  %v120_v5 = vsub.f32 0.0, %v44_v1  ;;  %s207_s1 = sshll.u32 %s331_s0, 4  ;;  %s208_s1 = int_to_ptr.vmem [resolvable:$true] %s207_s1 }
  0x1f   :  { %vm47_vm1 = vcmp.ne.s32.totalorder %v45_v2, 0  ;;  %vm48_vm2 = vcmp.ne.s32.totalorder %v46_v3, 0  ;;  %v369_v23 = vshrl.u32 %v49_v18, 7  ;;  %s278_s24 = scalar_lea.vmem %s208_s1, 64  ;;  %p283_p11 = scmp.lt.s32.totalorder %s208_s1, %s208_s1 }
  0x20   :  { %v52_v6 = vsel %vm47_vm1, -inf, %v43_v0  ;;  %v53_v7 = vsel %vm48_vm2, -inf, %v44_v1  ;;  %v360_v9 = vsel %vm47_vm1, -inf, %v119_v4  ;;  %v362_v10 = vsel %vm48_vm2, -inf, %v120_v5  ;;  %p279_p10 = scmp.ne.s32.totalorder %s208_s1, %s278_s24  ;;  %p284_p12 = scmp.lt.s32.totalorder %s278_s24, %s278_s24 }
  0x21   :  { %v55_v8 = vsel %vm484_vm0, %v52_v6, -inf  ;;  %v56_v11 = vsel %vm484_vm0, %v53_v7, -inf  ;;  %v123_v12 = vsel %vm484_vm0, %v360_v9, -inf  ;;  %v124_v13 = vsel %vm484_vm0, %v362_v10, -inf }
  0x22   :  { %v57_v14 = vmax.f32 %v55_v8, %v56_v11  ;;  %v125_v15 = vmax.f32 %v123_v12, %v124_v13  ;;  %v372_v28 = vadd.s32 8, %v369_v23  ;;  %p285_p13 = por %p284_p12, %p283_p11 }
  0x24   :  { %v58_v16 = vrot.slane %v57_v14, 4  ;;  %v126_v17 = vrot.slane %v125_v15, 4  ;;  %p286_p0 = pnand %p285_p13, %p279_p10 }
  0x26   :  { %v59_v19 = vmax.f32 %v57_v14, %v58_v16  ;;  %v127_v20 = vmax.f32 %v125_v15, %v126_v17 }
  0x28   :  { %v60_v21 = vrot.slane %v59_v19, 2  ;;  %v128_v22 = vrot.slane %v127_v20, 2 }
  0x2a   :  { %v61_v24 = vmax.f32 %v59_v19, %v60_v21  ;;  %v129_v25 = vmax.f32 %v127_v20, %v128_v22 }
  0x2c   :  { %v62_v26 = vrot.slane %v61_v24, 1  ;;  %v130_v27 = vrot.slane %v129_v25, 1 }
  0x2e   :  { %v374_v29 = vmax.f32 %v61_v24, %v62_v26  ;;  %v376_v30 = vmax.f32 %v129_v25, %v130_v27 }
  0x30   :  { %vm64_vm3 = vcmp.eq.f32.partialorder %v52_v6, %v374_v29  ;;  %vm65_vm4 = vcmp.eq.f32.partialorder %v53_v7, %v374_v29  ;;  %vm132_vm5 = vcmp.eq.f32.partialorder %v360_v9, %v376_v30  ;;  %vm133_vm6 = vcmp.eq.f32.partialorder %v362_v10, %v376_v30 }
  0x31   :  { %v66_v31 = vsel %vm64_vm3, %v369_v23, 16  ;;  %v67_v32 = vsel %vm65_vm4, %v372_v28, 16  ;;  %v134_v35 = vsel %vm132_vm5, %v369_v23, 16  ;;  %v390_v36 = vsel %vm133_vm6, %v372_v28, 16 }
  0x32   :  { %v68_v33 = vsel %vm484_vm0, %v66_v31, 2147483647  ;;  %v69_v34 = vsel %vm484_vm0, %v67_v32, 2147483647  ;;  %v136_v37 = vsel %vm484_vm0, %v134_v35, 2147483647 }
  0x33   :  { %vm70_vm7 = vcmp.lt.s32.totalorder %v68_v33, %v69_v34  ;;  %v137_v38 = vsel %vm484_vm0, %v390_v36, 2147483647  ;;  %vm83_vm4 = vcmp.eq.f32.partialorder %v374_v29, -inf  ;;  %v152_v8 = vsub.f32 0.0, %v376_v30 }
  0x34   :  { %v71_v39 = vsel %vm70_vm7, %v68_v33, %v69_v34  ;;  %vm138_vm8 = vcmp.lt.s32.totalorder %v136_v37, %v137_v38  ;;  %vm151_vm5 = vcmp.eq.f32.partialorder %v376_v30, -inf  ;;  %vm330_vm6 = vmmov 1  }
  0x35   :  { %v72_v40 = vrot.slane %v71_v39, 4  ;;  %v139_v41 = vsel %vm138_vm8, %v136_v37, %v137_v38  ;;  %vm189_vm8 = vcmask 1040384   ;;  %v84_v13 = vsel %vm83_vm4, 0.0, %v374_v29 }
  0x36   :  { %v140_v42 = vrot.slane %v139_v41, 4  ;;  %v153_v16 = vsel %vm151_vm5, 0.0, %v152_v8  ;;  %vm195_vm5 = vcmask 125952  }
  0x37   :  { %vm73_vm9 = vcmp.lt.s32.totalorder %v71_v39, %v72_v40 }
  0x38   :  { %v74_v43 = vsel %vm73_vm9, %v71_v39, %v72_v40  ;;  %vm141_vm10 = vcmp.lt.s32.totalorder %v139_v41, %v140_v42 }
  0x39   :  { %v75_v44 = vrot.slane %v74_v43, 2  ;;  %v142_v45 = vsel %vm141_vm10, %v139_v41, %v140_v42  ;;  %vm191_vm10 = vcmask 1041408  }
  0x3a   :  { %v143_v46 = vrot.slane %v142_v45, 2 }
  0x3b   :  { %vm76_vm11 = vcmp.lt.s32.totalorder %v74_v43, %v75_v44 }
  0x3c   :  { %v77_v47 = vsel %vm76_vm11, %v74_v43, %v75_v44  ;;  %vm144_vm12 = vcmp.lt.s32.totalorder %v142_v45, %v143_v46 }
  0x3d   :  { %v78_v48 = vrot.slane %v77_v47, 1  ;;  %v145_v49 = vsel %vm144_vm12, %v142_v45, %v143_v46 }
  0x3e   :  { %v146_v50 = vrot.slane %v145_v49, 1 }
  0x3f   :  { %vm79_vm13 = vcmp.lt.s32.totalorder %v77_v47, %v78_v48 }
  0x40   :  { %v395_v51 = vsel %vm79_vm13, %v77_v47, %v78_v48  ;;  %vm147_vm14 = vcmp.lt.s32.totalorder %v145_v49, %v146_v50 }
  0x41   :  { %vm81_vm15 = vcmp.eq.s32.totalorder %v66_v31, %v395_v51  ;;  %vm82_vm1 = vcmp.eq.s32.totalorder %v67_v32, %v395_v51  ;;  %v399_v52 = vsel %vm147_vm14, %v145_v49, %v146_v50 }
  0x42   :  { %v85_v53 = vsel %vm81_vm15, -inf, %v52_v6  ;;  %v86_v54 = vsel %vm82_vm1, -inf, %v53_v7  ;;  %vm149_vm2 = vcmp.eq.s32.totalorder %v134_v35, %v399_v52  ;;  %vm150_vm3 = vcmp.eq.s32.totalorder %v390_v36, %v399_v52  ;;  %vm424_vm7 = vmxor %vm81_vm15, %vm330_vm6 }
  0x43   :  { %v87_v55 = vsel %vm484_vm0, %v85_v53, -inf  ;;  %v88_v56 = vsel %vm484_vm0, %v86_v54, -inf  ;;  %v154_v57 = vsel %vm149_vm2, -inf, %v360_v9  ;;  %v155_v58 = vsel %vm150_vm3, -inf, %v362_v10  ;;  %vm430_vm9 = vmxor %vm82_vm1, %vm330_vm6 }
  0x44   :  { %v89_v59 = vmax.f32 %v87_v55, %v88_v56  ;;  %v156_v60 = vsel %vm484_vm0, %v154_v57, -inf  ;;  %v157_v61 = vsel %vm484_vm0, %v155_v58, -inf  ;;  %vm437_vm12 = vmxor %vm149_vm2, %vm330_vm6 }
  0x45   :  { %v158_v62 = vmax.f32 %v156_v60, %v157_v61  ;;  %vm444_vm1 = vmxor %vm150_vm3, %vm330_vm6  ;;  %vm493_vm6 = vcmask 130048  }
  0x46   :  { %v90_v63 = vrot.slane %v89_v59, 4 }
  0x47   :  { %v159_v0 = vrot.slane %v158_v62, 4 }
  0x48   :  { %v91_v1 = vmax.f32 %v89_v59, %v90_v63 }
  0x49   :  { %v160_v2 = vmax.f32 %v158_v62, %v159_v0 }
  0x4a   :  { %v92_v3 = vrot.slane %v91_v1, 2 }
  0x4b   :  { %v161_v4 = vrot.slane %v160_v2, 2 }
  0x4c   :  { %v93_v5 = vmax.f32 %v91_v1, %v92_v3 }
  0x4d   :  { %v162_v6 = vmax.f32 %v160_v2, %v161_v4 }
  0x4e   :  { %v94_v7 = vrot.slane %v93_v5, 1 }
  0x4f   :  { %v163_v9 = vrot.slane %v162_v6, 1 }
  0x50   :  { %v95_v11 = vmax.f32 %v93_v5, %v94_v7 }
  0x51   :  { %v164_v14 = vmax.f32 %v162_v6, %v163_v9 }
  0x52   :  { %vm117_vm13 = vcmp.eq.f32.partialorder %v95_v11, -inf  ;;  %vm96_vm14 = vcmp.eq.f32.partialorder %v85_v53, %v95_v11  ;;  %vm97_vm15 = vcmp.eq.f32.partialorder %v86_v54, %v95_v11 }
  0x53   :  { %v118_v18 = vsel %vm117_vm13, 0.0, %v95_v11  ;;  %vm186_vm4 = vcmp.eq.f32.partialorder %v164_v14, -inf  ;;  %v187_v19 = vsub.f32 0.0, %v164_v14  ;;  %vm100_vm2 = vmand %vm96_vm14, %vm424_vm7  ;;  %vm165_vm11 = vcmp.eq.f32.partialorder %v154_v57, %v164_v14 }
  0x54   :  { %v190_v20 = vsel %vm189_vm8, %v84_v13, %v118_v18  ;;  %vm101_vm0 = vmand %vm97_vm15, %vm430_vm9  ;;  %v102_v21 = vsel %vm100_vm2, %v369_v23, 16  ;;  %vm166_vm3 = vcmp.eq.f32.partialorder %v155_v58, %v164_v14  ;;  %vm494_vm13 = vcmask 1042432  }
  0x55   :  { %v188_v22 = vsel %vm186_vm4, 0.0, %v187_v19  ;;  %v192_v24 = vsel %vm191_vm10, %v190_v20, %v153_v16  ;;  %v103_v25 = vsel %vm101_vm0, %v372_v28, 16  ;;  %v104_v26 = vsel %vm493_vm6, %v102_v21, 2147483647  ;;  %vm169_vm7 = vmand %vm165_vm11, %vm437_vm12 }
  0x56   :  { %v194_v27 = vsel %vm494_vm13, %v192_v24, %v188_v22  ;;  %vm495_vm14 = vmmov %vm493_vm6  ;;  %v171_v30 = vsel %vm169_vm7, %v369_v23, 16 }
  0x57   :  { %v105_v29 = vsel %vm495_vm14, %v103_v25, 2147483647  ;;  %vm170_vm9 = vmand %vm166_vm3, %vm444_vm1  ;;  %196 = vst.msk [vmem:[#allocation7] sm:$0xf] %vm195_vm5, %v194_v27 }
  0x58   :  { %vm106_vm15 = vcmp.lt.s32.totalorder %v104_v26, %v105_v29  ;;  %v172_v31 = vsel %vm170_vm9, %v372_v28, 16  ;;  %vm496_vm0 = vmmov %vm493_vm6 }
  0x59   :  { %v173_v32 = vsel %vm496_vm0, %v171_v30, 2147483647  ;;  %v107_v33 = vsel %vm106_vm15, %v104_v26, %v105_v29  ;;  %vm497_vm4 = vmmov %vm496_vm0 }
  0x5a   :  { %v174_v34 = vsel %vm497_vm4, %v172_v31, 2147483647 }
  0x5b   :  { %289 = shalt.err (!%p286_p0)
}
  0x5c   :  { %210 = dma.vmem_to_hbm [thread:$0]  %s208_s1, 64, %s482_s2, [#allocation4]   ;;  %v108_v23 = vrot.slane %v107_v33, 4  ;;  %vm175_vm11 = vcmp.lt.s32.totalorder %v173_v32, %v174_v34 }
  0x5d   :  { %v176_v35 = vsel %vm175_vm11, %v173_v32, %v174_v34  ;;  %s332_s27 = smov [#allocation8]  }
  0x5e   :  { %vm109_vm12 = vcmp.lt.s32.totalorder %v107_v33, %v108_v23  ;;  %v177_v28 = vrot.slane %v176_v35, 4  ;;  %s217_s28 = sshll.u32 %s332_s27, 4  ;;  %s218_s28 = int_to_ptr.vmem [resolvable:$true] %s217_s28 }
  0x5f   :  { %v110_v36 = vsel %vm109_vm12, %v107_v33, %v108_v23  ;;  %s298_s2 = scalar_lea.vmem %s218_s28, 64  ;;  %p303_p2 = scmp.lt.s32.totalorder %s218_s28, %s218_s28 }
  0x60   :  { %v111_v37 = vrot.slane %v110_v36, 2  ;;  %vm178_vm1 = vcmp.lt.s32.totalorder %v176_v35, %v177_v28  ;;  %p299_p1 = scmp.ne.s32.totalorder %s218_s28, %s298_s2  ;;  %p304_p3 = scmp.lt.s32.totalorder %s298_s2, %s298_s2 }
  0x61   :  { %v179_v38 = vsel %vm178_vm1, %v176_v35, %v177_v28 }
  0x62   :  { %vm112_vm2 = vcmp.lt.s32.totalorder %v110_v36, %v111_v37  ;;  %v180_v39 = vrot.slane %v179_v38, 2  ;;  %p305_p4 = por %p304_p3, %p303_p2 }
  0x63   :  { %v113_v40 = vsel %vm112_vm2, %v110_v36, %v111_v37 }
  0x64   :  { %v114_v41 = vrot.slane %v113_v40, 1  ;;  %vm181_vm3 = vcmp.lt.s32.totalorder %v179_v38, %v180_v39  ;;  %p306_p5 = pnand %p305_p4, %p299_p1 }
  0x65   :  { %v182_v42 = vsel %vm181_vm3, %v179_v38, %v180_v39 }
  0x66   :  { %vm115_vm6 = vcmp.lt.s32.totalorder %v113_v40, %v114_v41  ;;  %v183_v43 = vrot.slane %v182_v42, 1 }
  0x67   :  { %v116_v44 = vsel %vm115_vm6, %v113_v40, %v114_v41 }
  0x68   :  { %vm184_vm7 = vcmp.lt.s32.totalorder %v182_v42, %v183_v43  ;;  %v197_v45 = vsel %vm189_vm8, %v395_v51, %v116_v44 }
  0x69   :  { %v185_v46 = vsel %vm184_vm7, %v182_v42, %v183_v43  ;;  %v198_v47 = vsel %vm191_vm10, %v197_v45, %v399_v52 }
  0x6a   :  { %v199_v48 = vsel %vm494_vm13, %v198_v47, %v185_v46 }
  0x6b   :  { %200 = vst.msk [vmem:[#allocation8] sm:$0xf] %vm195_vm5, %v199_v48 }
  0x6c   :  { %309 = shalt.err (!%p306_p5)
}
  0x6d   :  { %220 = dma.vmem_to_hbm [thread:$0]  %s218_s28, 64, %s483_s3, [#allocation9]  }
  0x6e   :  { %322 = dma.done.wait [#allocation4], 64  }
  0x6f   :  { %323 = vsyncadd [#allocation4], 4294967232 }
  0x70   :  { %324 = dma.done.wait [#allocation9], 64  }
  0x71   :  { %325 = vsyncadd [#allocation9], 4294967232 }
  0x72   :  { %227 = vsyncpa [#allocation3], 1 }
  0x73   :  { %228 = vsyncpa [#allocation6], 1 }
  0x74   :  { %229 = vsyncpa [#allocation4], 1 }
  0x75   :  { %230 = vsyncpa [#allocation9], 1 }

</bundles_post_ra>
